<compile_context>
chip_gen: v6e
topology: v6e:2x2x1
jax: 0.10.0
libtpu: 0.0.40
codegen_flags: <defaults>
</compile_context>

<pallas_src>
import jax
import jax.numpy as jnp
from jax.experimental import pallas as pl
from jax.experimental.pallas import tpu as pltpu


def _round_up(n, m):
    return ((n + m - 1) // m) * m


def _make_single_tile_kernel(batch, rows, eps, mxu_dtype):
    """Whole (padded) batch in one tile: compute h once, stats + BN + ReLU + W2."""
    npad = float(rows - batch)
    inv_n = 1.0 / batch

    def kernel(x_ref, w1_ref, gamma_ref, beta_ref, w2_ref, b2_ref, o_ref):
        h = jnp.dot(x_ref[...], w1_ref[...], preferred_element_type=jnp.float32)
        # Shifted one-pass stats (shift = first row of h). Padded x rows give
        # h == 0 exactly (zero-padded x, no b1), so correct their contribution
        # in closed form instead of masking per element.
        c = h[0:1, :]
        hc = h - c
        s1 = jnp.sum(hc, axis=0, keepdims=True) + npad * c
        s2 = jnp.sum(hc * hc, axis=0, keepdims=True) - npad * c * c
        m1 = s1 * inv_n
        var = jnp.maximum(s2 * inv_n - m1 * m1, 0.0)
        mean = c + m1
        inv_std = jax.lax.rsqrt(var + eps)                 # [1, latent], EUP slot
        scale = gamma_ref[...] * inv_std                   # fold BN affine
        shift = beta_ref[...] - mean * scale
        hn = jnp.maximum(h * scale + shift, 0.0)           # BN + ReLU in one FMA pass
        out = jnp.dot(hn.astype(mxu_dtype), w2_ref[...],
                      preferred_element_type=jnp.float32) + b2_ref[...]
        o_ref[...] = out.astype(o_ref.dtype)

    return kernel


def _make_tiled_kernel(batch, b_pad, eps, mxu_dtype, use_h_cache):
    """Two-phase streaming kernel: phase 0 = stats (+ optional h-cache fill),
    phase 1 = folded BN + ReLU + second matmul."""
    npad = float(b_pad - batch)
    inv_n = 1.0 / batch

    def kernel(x_ref, w1_ref, gamma_ref, beta_ref, w2_ref, b2_ref, o_ref,
               c_ref, s1_ref, s2_ref, scale_ref, shift_ref, *hbuf):
        phase = pl.program_id(0)
        bt = pl.program_id(1)

        @pl.when(phase == 0)
        def _stats_pass():
            h = jnp.dot(x_ref[...], w1_ref[...],
                        preferred_element_type=jnp.float32)

            @pl.when(bt == 0)
            def _init():
                c_ref[...] = h[0:1, :]
                s1_ref[...] = jnp.zeros_like(s1_ref)
                s2_ref[...] = jnp.zeros_like(s2_ref)
                # Insurance: the output block is pinned to (0, 0) during phase 0;
                # write zeros once so no uninitialized VMEM could ever be copied
                # back. It is fully overwritten at (phase=1, bt=0).
                o_ref[...] = jnp.zeros_like(o_ref)

            # No per-row mask / iota in the hot loop: padded x rows give h == 0
            # exactly; their bias is removed in closed form at finalize.
            hc = h - c_ref[...]
            s1_ref[...] += jnp.sum(hc, axis=0, keepdims=True)
            s2_ref[...] += jnp.sum(hc * hc, axis=0, keepdims=True)
            if use_h_cache:
                hbuf[0][bt] = h.astype(hbuf[0].dtype)

        @pl.when(phase == 1)
        def _output_pass():
            @pl.when(bt == 0)
            def _finalize_stats():
                c = c_ref[...]
                s1 = s1_ref[...] + npad * c            # undo padded-row contribution
                s2 = s2_ref[...] - npad * c * c
                m1 = s1 * inv_n
                var = jnp.maximum(s2 * inv_n - m1 * m1, 0.0)
                mean = c + m1
                inv_std = jax.lax.rsqrt(var + eps)     # [1, latent], EUP slot
                scale_ref[...] = gamma_ref[...] * inv_std
                shift_ref[...] = beta_ref[...] - mean * scale_ref[...]

            if use_h_cache:
                h = hbuf[0][bt].astype(jnp.float32)    # skip x@W1 recompute
            else:
                h = jnp.dot(x_ref[...], w1_ref[...],
                            preferred_element_type=jnp.float32)
            hn = jnp.maximum(h * scale_ref[...] + shift_ref[...], 0.0)
            out = jnp.dot(hn.astype(mxu_dtype), w2_ref[...],
                          preferred_element_type=jnp.float32) + b2_ref[...]
            o_ref[...] = out.astype(o_ref.dtype)

    return kernel


def mlp_forward(x, w1, gamma, beta, w2, b2, *, eps=1e-5,
                mxu_dtype=jnp.bfloat16, tile_m=None, use_h_cache=None):
    """Fused Linear -> BatchNorm1d(train-mode) -> ReLU -> Linear forward."""
    batch, inp_dim = x.shape
    latent_dim = w1.shape[1]
    out_dim = w2.shape[1]
    out_dtype = x.dtype

    # Batch tile: up to 512 rows (pushes streaming DMAs toward HBM roofline);
    # 16-row granularity for bf16 sublane packing.
    if tile_m is None:
        tile_m = min(512, _round_up(batch, 16))
    else:
        tile_m = _round_up(tile_m, 16)
    b_pad = _round_up(batch, tile_m)
    n_bt = b_pad // tile_m
    l_pad = _round_up(latent_dim, 128)   # lane-align latent: dense h vregs, full-K matmul
    n_pad = _round_up(out_dim, 128)      # lane-dense output stores (no vst.msk)

    itm = jnp.dtype(mxu_dtype).itemsize
    out_itm = jnp.dtype(out_dtype).itemsize

    # Cast MXU operands once, outside the kernel (bf16 default halves HBM/VMEM
    # traffic and runs at full MXU rate on all generations incl. v5e).
    x_c = x.astype(mxu_dtype)
    w1_c = w1.astype(mxu_dtype)
    w2_c = w2.astype(mxu_dtype)
    gamma_c = gamma.reshape(1, -1).astype(jnp.float32)
    beta_c = beta.reshape(1, -1).astype(jnp.float32)
    b2_c = b2.reshape(1, -1).astype(jnp.float32)

    if b_pad != batch:                       # padded rows: h == 0, corrected at finalize
        x_c = jnp.pad(x_c, ((0, b_pad - batch), (0, 0)))
    if l_pad != latent_dim:                  # padded latent cols: scale = shift = 0
        w1_c = jnp.pad(w1_c, ((0, 0), (0, l_pad - latent_dim)))
        w2_c = jnp.pad(w2_c, ((0, l_pad - latent_dim), (0, 0)))
        gamma_c = jnp.pad(gamma_c, ((0, 0), (0, l_pad - latent_dim)))
        beta_c = jnp.pad(beta_c, ((0, 0), (0, l_pad - latent_dim)))
    if n_pad != out_dim:
        w2_c = jnp.pad(w2_c, ((0, 0), (0, n_pad - out_dim)))
        b2_c = jnp.pad(b2_c, ((0, 0), (0, n_pad - out_dim)))

    # Explicit VMEM budgeting (sized so the default path fits v7x's 64 MiB core).
    resident_bytes = ((inp_dim * l_pad + l_pad * n_pad) * itm
                      + (2 * l_pad + n_pad) * 4)
    stream_bytes = 2 * (tile_m * inp_dim * itm + tile_m * n_pad * out_itm)
    scratch_bytes = 5 * l_pad * 4
    cache_bytes = b_pad * l_pad * itm
    _HCACHE_BUDGET = 48 << 20
    if use_h_cache is None:
        use_h_cache = (resident_bytes + stream_bytes + scratch_bytes
                       + cache_bytes) <= _HCACHE_BUDGET
    total_bytes = (2 * resident_bytes + stream_bytes + scratch_bytes
                   + (cache_bytes if use_h_cache else 0))
    vmem_limit = min(max(int(total_bytes * 1.25) + (2 << 20), 32 << 20), 100 << 20)
    # TODO(synk): when resident_bytes alone exceeds the per-core VMEM budget
    # (very large latent/out dims), add grid axes tiling W2's N and W1's K with
    # accumulation instead of keeping the whole weights resident.

    # ---- single-tile fast path: one grid-less pass, no recompute, no phases ----
    if n_bt == 1:
        kernel = _make_single_tile_kernel(batch, b_pad, eps, mxu_dtype)
        out = pl.pallas_call(
            kernel,
            out_shape=jax.ShapeDtypeStruct((b_pad, n_pad), out_dtype),
            compiler_params=pltpu.CompilerParams(vmem_limit_bytes=vmem_limit),
        )(x_c, w1_c, gamma_c, beta_c, w2_c, b2_c)
        return out[:batch, :out_dim]

    # ---- two-phase streaming path ----
    kernel = _make_tiled_kernel(batch, b_pad, eps, mxu_dtype, use_h_cache)

    # With the h-cache, phase 1 never reads x: pin its block index to 0 so x is
    # not re-DMA'd during the output pass.
    x_index_map = ((lambda p, b: (b * (1 - p), 0)) if use_h_cache
                   else (lambda p, b: (b, 0)))

    scratch_shapes = [
        pltpu.VMEM((1, l_pad), jnp.float32),   # c   (per-feature shift)
        pltpu.VMEM((1, l_pad), jnp.float32),   # sum(h - c)
        pltpu.VMEM((1, l_pad), jnp.float32),   # sum((h - c)^2)
        pltpu.VMEM((1, l_pad), jnp.float32),   # folded BN scale
        pltpu.VMEM((1, l_pad), jnp.float32),   # folded BN shift
    ]
    if use_h_cache:
        scratch_shapes.append(pltpu.VMEM((n_bt, tile_m, l_pad), mxu_dtype))

    def _call(single_buffer_resident):
        if single_buffer_resident:
            # Constant index_map => block never changes; one buffer is enough.
            def resident(shape):
                return pl.BlockSpec(shape, lambda p, b: (0, 0),
                                    pipeline_mode=pl.Buffered(1))
        else:
            def resident(shape):
                return pl.BlockSpec(shape, lambda p, b: (0, 0))

        return pl.pallas_call(
            kernel,
            out_shape=jax.ShapeDtypeStruct((b_pad, n_pad), out_dtype),
            grid=(2, n_bt),
            in_specs=[
                pl.BlockSpec((tile_m, inp_dim), x_index_map),  # x: streamed
                resident((inp_dim, l_pad)),                    # W1
                resident((1, l_pad)),                          # gamma
                resident((1, l_pad)),                          # beta
                resident((l_pad, n_pad)),                      # W2
                resident((1, n_pad)),                          # b2
            ],
            # Phase 0 pins the output block to 0 (it writes zeros once as
            # insurance); real data is written in phase 1.
            out_specs=pl.BlockSpec((tile_m, n_pad), lambda p, b: (b * p, 0)),
            scratch_shapes=scratch_shapes,
            compiler_params=pltpu.CompilerParams(
                dimension_semantics=("arbitrary", "arbitrary"),
                vmem_limit_bytes=vmem_limit),
        )(x_c, w1_c, gamma_c, beta_c, w2_c, b2_c)

    # TODO(synk): on v7x, split the batch axis across the 2 TensorCores (stats
    # kernel with a 'parallel' batch axis + XLA reduce of per-tile s1/s2, or
    # core_map with a cross-core reduction through VMEM_SHARED/CMEM) instead of
    # running everything on a single core.
    try:
        out = _call(True)      # single-buffered resident weights (halves their VMEM)
    except Exception:          # pl.Buffered(1) unsupported on this jax version
        out = _call(False)

    return out[:batch, :out_dim]


def init_params(key, inp_dim, latent_dim, out_dim):
    """PyTorch-style init: Linear ~ U(-1/sqrt(fan_in), 1/sqrt(fan_in)),
    BatchNorm gamma=1, beta=0. b1 is returned for the reference only; the
    kernel drops it (cancelled exactly by train-mode BatchNorm)."""
    k1, k2, k3, k4 = jax.random.split(key, 4)
    bound1 = 1.0 / jnp.sqrt(inp_dim)
    bound2 = 1.0 / jnp.sqrt(latent_dim)
    # weights stored as [in_features, out_features] (transposed vs torch)
    w1 = jax.random.uniform(k1, (inp_dim, latent_dim), jnp.float32, -bound1, bound1)
    b1 = jax.random.uniform(k2, (1, latent_dim), jnp.float32, -bound1, bound1)
    gamma = jnp.ones((1, latent_dim), jnp.float32)
    beta = jnp.zeros((1, latent_dim), jnp.float32)
    w2 = jax.random.uniform(k3, (latent_dim, out_dim), jnp.float32, -bound2, bound2)
    b2 = jax.random.uniform(k4, (1, out_dim), jnp.float32, -bound2, bound2)
    return w1, b1, gamma, beta, w2, b2


def mlp_reference(x, w1, b1, gamma, beta, w2, b2):
    """Pure-JAX reference with exact PyTorch train-mode semantics (incl. b1)."""
    h = x @ w1 + b1
    mean = jnp.mean(h, axis=0, keepdims=True)
    var = jnp.mean((h - mean) ** 2, axis=0, keepdims=True)
    h = (h - mean) * jax.lax.rsqrt(var + 1e-5)
    h = h * gamma + beta
    h = jnp.maximum(h, 0.0)
    return h @ w2 + b2


if __name__ == "__main__":
    B, inp_dim, latent_dim, out_dim = 8, 32, 64, 16

    key = jax.random.PRNGKey(0)
    kx, kp = jax.random.split(key)
    x = jax.random.normal(kx, (B, inp_dim), jnp.float32)
    w1, b1, gamma, beta, w2, b2 = init_params(kp, inp_dim, latent_dim, out_dim)
    ref = mlp_reference(x, w1, b1, gamma, beta, w2, b2)

    # Single-tile fast path, exact f32 MXU operands.
    out_f32 = jax.block_until_ready(
        mlp_forward(x, w1, gamma, beta, w2, b2, mxu_dtype=jnp.float32))
    assert out_f32.shape == (B, out_dim)
    assert jnp.allclose(out_f32, ref, atol=1e-4, rtol=1e-4), "f32 single-tile mismatch"

    # Single-tile fast path, bf16 MXU default (f32 accumulation).
    out_bf16 = jax.block_until_ready(mlp_forward(x, w1, gamma, beta, w2, b2))
    assert out_bf16.shape == (B, out_dim)
    assert jnp.allclose(out_bf16, ref, atol=5e-2, rtol=5e-2), "bf16 single-tile mismatch"

    # Multi-tile streaming path with the h-cache (forced small tile_m).
    B2 = 40
    x2 = jax.random.normal(jax.random.PRNGKey(1), (B2, inp_dim), jnp.float32)
    ref2 = mlp_reference(x2, w1, b1, gamma, beta, w2, b2)
    out2 = jax.block_until_ready(
        mlp_forward(x2, w1, gamma, beta, w2, b2, mxu_dtype=jnp.float32, tile_m=16))
    assert out2.shape == (B2, out_dim)
    assert jnp.allclose(out2, ref2, atol=1e-4, rtol=1e-4), "f32 tiled (h-cache) mismatch"

    # Multi-tile streaming path without the h-cache (recompute fallback).
    out3 = jax.block_until_ready(
        mlp_forward(x2, w1, gamma, beta, w2, b2, mxu_dtype=jnp.float32,
                    tile_m=16, use_h_cache=False))
    assert jnp.allclose(out3, ref2, atol=1e-4, rtol=1e-4), "f32 tiled (recompute) mismatch"

    print("KERNEL_OK")
</pallas_src>

<mosaic_0001>
module attributes {stable_mosaic.version = 11 : i64} {
  func.func @kernel(%arg0: memref<16x32xf32, #tpu.memory_space<vmem>>, %arg1: memref<32x128xf32, #tpu.memory_space<vmem>>, %arg2: memref<1x128xf32, #tpu.memory_space<vmem>>, %arg3: memref<1x128xf32, #tpu.memory_space<vmem>>, %arg4: memref<128x128xf32, #tpu.memory_space<vmem>>, %arg5: memref<1x128xf32, #tpu.memory_space<vmem>>, %arg6: memref<16x128xf32, #tpu.memory_space<vmem>>) attributes {dimension_semantics = [], scalar_prefetch = 0 : i64, scratch_operands = 0 : i64, tpu.core_type = #tpu.core_type<tc>} {
    %c0 = arith.constant 0 : index
    %c0_0 = arith.constant 0 : index
    %0 = vector.load %arg0[%c0, %c0_0] : memref<16x32xf32, #tpu.memory_space<vmem>>, vector<16x32xf32>
    %c0_1 = arith.constant 0 : index
    %c0_2 = arith.constant 0 : index
    %1 = vector.load %arg1[%c0_1, %c0_2] : memref<32x128xf32, #tpu.memory_space<vmem>>, vector<32x128xf32>
    %cst = arith.constant dense<0.000000e+00> : vector<16x128xf32>
    %2 = tpu.matmul %0, %1, %cst {dimension_numbers = #tpu.dot_dimension_numbers<[1], [0], [0], [1], [0, 0, 1, 1], [], []>} : vector<16x32xf32>, vector<32x128xf32>, vector<16x128xf32> -> vector<16x128xf32>
    %3 = vector.extract_strided_slice %2 {offsets = [0, 0], sizes = [1, 128], strides = [1, 1]} : vector<16x128xf32> to vector<1x128xf32>
    %4 = vector.broadcast %3 : vector<1x128xf32> to vector<16x128xf32>
    %5 = arith.subf %2, %4 : vector<16x128xf32>
    %cst_3 = arith.constant dense<0.000000e+00> : vector<128xf32>
    %6 = vector.multi_reduction <add>, %5, %cst_3 [0] : vector<16x128xf32> to vector<128xf32>
    %7 = vector.shape_cast %6 : vector<128xf32> to vector<1x128xf32>
    %cst_4 = arith.constant 8.000000e+00 : f32
    %8 = vector.broadcast %cst_4 : f32 to vector<1x128xf32>
    %9 = arith.mulf %8, %3 : vector<1x128xf32>
    %10 = arith.addf %7, %9 : vector<1x128xf32>
    %11 = arith.mulf %5, %5 : vector<16x128xf32>
    %cst_5 = arith.constant dense<0.000000e+00> : vector<128xf32>
    %12 = vector.multi_reduction <add>, %11, %cst_5 [0] : vector<16x128xf32> to vector<128xf32>
    %13 = vector.shape_cast %12 : vector<128xf32> to vector<1x128xf32>
    %cst_6 = arith.constant 8.000000e+00 : f32
    %14 = vector.broadcast %cst_6 : f32 to vector<1x128xf32>
    %15 = arith.mulf %14, %3 : vector<1x128xf32>
    %16 = arith.mulf %15, %3 : vector<1x128xf32>
    %17 = arith.subf %13, %16 : vector<1x128xf32>
    %cst_7 = arith.constant 1.250000e-01 : f32
    %18 = vector.broadcast %cst_7 : f32 to vector<1x128xf32>
    %19 = arith.mulf %10, %18 : vector<1x128xf32>
    %cst_8 = arith.constant 1.250000e-01 : f32
    %20 = vector.broadcast %cst_8 : f32 to vector<1x128xf32>
    %21 = arith.mulf %17, %20 : vector<1x128xf32>
    %22 = arith.mulf %19, %19 : vector<1x128xf32>
    %23 = arith.subf %21, %22 : vector<1x128xf32>
    %cst_9 = arith.constant 0.000000e+00 : f32
    %24 = vector.broadcast %cst_9 : f32 to vector<1x128xf32>
    %25 = arith.maximumf %23, %24 : vector<1x128xf32>
    %26 = arith.addf %3, %19 : vector<1x128xf32>
    %cst_10 = arith.constant 9.99999974E-6 : f32
    %27 = vector.broadcast %cst_10 : f32 to vector<1x128xf32>
    %28 = arith.addf %25, %27 : vector<1x128xf32>
    %29 = math.rsqrt %28 : vector<1x128xf32>
    %c0_11 = arith.constant 0 : index
    %c0_12 = arith.constant 0 : index
    %30 = vector.load %arg2[%c0_11, %c0_12] : memref<1x128xf32, #tpu.memory_space<vmem>>, vector<1x128xf32>
    %31 = arith.mulf %30, %29 : vector<1x128xf32>
    %c0_13 = arith.constant 0 : index
    %c0_14 = arith.constant 0 : index
    %32 = vector.load %arg3[%c0_13, %c0_14] : memref<1x128xf32, #tpu.memory_space<vmem>>, vector<1x128xf32>
    %33 = arith.mulf %26, %31 : vector<1x128xf32>
    %34 = arith.subf %32, %33 : vector<1x128xf32>
    %35 = vector.broadcast %31 : vector<1x128xf32> to vector<16x128xf32>
    %36 = arith.mulf %2, %35 : vector<16x128xf32>
    %37 = vector.broadcast %34 : vector<1x128xf32> to vector<16x128xf32>
    %38 = arith.addf %36, %37 : vector<16x128xf32>
    %cst_15 = arith.constant 0.000000e+00 : f32
    %39 = vector.broadcast %cst_15 : f32 to vector<16x128xf32>
    %40 = arith.maximumf %38, %39 : vector<16x128xf32>
    %c0_16 = arith.constant 0 : index
    %c0_17 = arith.constant 0 : index
    %41 = vector.load %arg4[%c0_16, %c0_17] : memref<128x128xf32, #tpu.memory_space<vmem>>, vector<128x128xf32>
    %cst_18 = arith.constant dense<0.000000e+00> : vector<16x128xf32>
    %42 = tpu.matmul %40, %41, %cst_18 {dimension_numbers = #tpu.dot_dimension_numbers<[1], [0], [0], [1], [0, 0, 1, 1], [], []>} : vector<16x128xf32>, vector<128x128xf32>, vector<16x128xf32> -> vector<16x128xf32>
    %c0_19 = arith.constant 0 : index
    %c0_20 = arith.constant 0 : index
    %43 = vector.load %arg5[%c0_19, %c0_20] : memref<1x128xf32, #tpu.memory_space<vmem>>, vector<1x128xf32>
    %44 = vector.broadcast %43 : vector<1x128xf32> to vector<16x128xf32>
    %45 = arith.addf %42, %44 : vector<16x128xf32>
    %c0_21 = arith.constant 0 : index
    %c0_22 = arith.constant 0 : index
    %46 = vector.load %arg6[%c0_21, %c0_22] : memref<16x128xf32, #tpu.memory_space<vmem>>, vector<16x128xf32>
    tpu.vector_store %arg6[%c0_21, %c0_22], %45 {strides = array<i32>} : memref<16x128xf32, #tpu.memory_space<vmem>>, vector<16x128xf32>,
    return
  }
}

</mosaic_0001>

<bundles_post_ra>
// kernel: tpu_custom_call.1
= control target key start
LH: loop header
LB: loop body
LE: loop exit
PB: predicated region body
PF: predicated region fallthrough
CT: control target
= control target key end

     0   :  { %11 = vsyncpa [#allocation3], 0  ;;  %s571_s0 = inlined_call_operand.hbm [shape: f32[16,32], index: 0, kind: input, shape index: {}]   ;;  %s572_s1 = inlined_call_operand.hbm [shape: f32[32,128], index: 1, kind: input, shape index: {}]   ;;  %s573_s2 = inlined_call_operand.vmem [shape: f32[1,128], index: 2, kind: input, shape index: {}]   ;;  %s574_s3 = inlined_call_operand.vmem [shape: f32[1,128], index: 3, kind: input, shape index: {}]   ;;  %s575_s4 = inlined_call_operand.hbm [shape: f32[128,128], index: 4, kind: input, shape index: {}]   ;;  %s576_s5 = inlined_call_operand.vmem [shape: f32[1,128], index: 5, kind: input, shape index: {}]   ;;  %s577_s6 = inlined_call_operand.hbm [shape: f32[16,128], index: 6, kind: output, shape index: {}]  }
   0x1   :  { %12 = vsyncpa [#allocation6], 0 }
   0x2   :  { %13 = vsyncpa [#allocation4], 0  ;;  %s495_s21 = smov [#allocation5]   ;;  %s496_s23 = smov [#allocation2]  }
   0x3   :  { %s31_s22 = sshll.u32 %s495_s21, 4  ;;  %s19_s24 = sshll.u32 %s496_s23, 4  ;;  %s32_s22 = int_to_ptr.vmem [resolvable:$true] %s31_s22  ;;  %s20_s24 = int_to_ptr.vmem [resolvable:$true] %s19_s24 }
   0x4   :  { %s417_s25 = scalar_lea.vmem %s32_s22, 512  ;;  %p422_p1 = scmp.lt.s32.totalorder %s32_s22, %s32_s22 }
   0x5   :  { %p418_p0 = scmp.ne.s32.totalorder %s32_s22, %s417_s25  ;;  %p423_p2 = scmp.lt.s32.totalorder %s417_s25, %s417_s25 }
   0x7   :  { %p424_p3 = por %p423_p2, %p422_p1 }
   0x9   :  { %p425_p4 = pnand %p424_p3, %p418_p0 }
   0xb   :  { %428 = shalt.err (!%p425_p4)
}
   0xc   :  { %s497_s26 = smov 128   ;;  %s498_s27 = smov 8  }
   0xd   :  { %37 = dma.hbm_to_vmem [thread:$0]  %s572_s1, 512, %s32_s22, [#allocation6], %s497_s26, %s497_s26, %s498_s27  }
   0xe   :  { %s437_s30 = scalar_lea.vmem %s20_s24, 256  ;;  %p442_p6 = scmp.lt.s32.totalorder %s20_s24, %s20_s24 }
   0xf   :  { %p438_p5 = scmp.ne.s32.totalorder %s20_s24, %s437_s30  ;;  %p443_p7 = scmp.lt.s32.totalorder %s437_s30, %s437_s30 }
  0x11   :  { %p444_p8 = por %p443_p7, %p442_p6 }
  0x13   :  { %p445_p9 = pnand %p444_p8, %p438_p5 }
  0x15   :  { %448 = shalt.err (!%p445_p9)
}
  0x16   :  { %25 = dma.hbm_to_vmem [thread:$0]  %s571_s0, 256, %s20_s24, [#allocation3], %s497_s26, %s497_s26, %s498_s27  }
  0x17   :  { %s499_s9 = smov [#allocation7]  }
  0x18   :  { %s47_s10 = sshll.u32 %s499_s9, 4  ;;  %s48_s10 = int_to_ptr.vmem [resolvable:$true] %s47_s10 }
  0x19   :  { %s457_s11 = scalar_lea.vmem %s48_s10, 2048  ;;  %p462_p11 = scmp.lt.s32.totalorder %s48_s10, %s48_s10 }
  0x1a   :  { %p458_p10 = scmp.ne.s32.totalorder %s48_s10, %s457_s11  ;;  %p463_p12 = scmp.lt.s32.totalorder %s457_s11, %s457_s11 }
  0x1c   :  { %p464_p13 = por %p463_p12, %p462_p11 }
  0x1e   :  { %p465_p0 = pnand %p464_p13, %p458_p10 }
  0x20   :  { %468 = shalt.err (!%p465_p0)
}
  0x21   :  { %53 = dma.hbm_to_vmem [thread:$0]  %s575_s4, 2048, %s48_s10, [#allocation6], %s497_s26, %s497_s26, %s498_s27  }
  0x22   :  { %489 = dma.done.wait [#allocation3], 256  }
  0x23   :  { %490 = vsyncadd [#allocation3], 4294967040 }
  0x24   :  { %491 = dma.done.wait [#allocation6], 2560  }
  0x25   :  { %492 = vsyncadd [#allocation6], 4294964736  ;;  %vm71_vm0 = vcmask 261120   ;;  %v70_v0 = vld [vmem:[#allocation5 + $0x18] sm:$0xff]  ;;  %v69_v1 = vld [vmem:[#allocation5 + $0x10] sm:$0xff]  ;;  %v153_v22 = vlaneseq  ;;  %s500_s16 = smov [#allocation8]  }
  0x26   :  { %355 = vmatprep.subr.mxu0 %v70_v0  ;;  %v65_v2 = vld [vmem:[#allocation2] sm:$0xff]  ;;  %v68_v3 = vld [vmem:[#allocation5 + $0x8] sm:$0xff]  ;;  %v67_v4 = vld [vmem:[#allocation5] sm:$0xff]  ;;  %s315_s17 = sshll.u32 %s500_s16, 4  ;;  %s316_s17 = int_to_ptr.vmem [resolvable:$true] %s315_s17 }
  0x27   :  { %356 = vmatpush3.msra.mxu0 %v70_v0  ;;  %363 = vmatprep.mubr.msk.f32.mxu0 %vm71_vm0, %v65_v2  ;;  %v66_v5 = vld [vmem:[#allocation2 + $0x8] sm:$0xff]  ;;  %v224_v7 = vld [vmem:[#allocation7 + $0x70] sm:$0xff]  ;;  %v223_v8 = vld [vmem:[#allocation7 + $0x68] sm:$0xff]  ;;  %v154_v23 = vshrl.u32 %v153_v22, 7  ;;  %p474_p2 = scmp.lt.s32.totalorder %s316_s17, %s316_s17 }
  0x28   :  { %357 = vmatprep.subr.mxu0 %v69_v1  ;;  %v225_v6 = vld [vmem:[#allocation7 + $0x78] sm:$0xff]  ;;  %v222_v9 = vld [vmem:[#allocation7 + $0x60] sm:$0xff]  ;;  %v220_v11 = vld [vmem:[#allocation7 + $0x50] sm:$0xff] }
  0x29   :  { %358 = vmatpush3.msra.mxu0 %v69_v1  ;;  %366 = vmatprep.subr.mxu1 %v225_v6  ;;  %v221_v10 = vld [vmem:[#allocation7 + $0x58] sm:$0xff]  ;;  %v219_v12 = vld [vmem:[#allocation7 + $0x48] sm:$0xff]  ;;  %v218_v13 = vld [vmem:[#allocation7 + $0x40] sm:$0xff]  ;;  %v155_v24 = vsub.s32 0, %v154_v23 }
  0x2a   :  { %359 = vmatprep.subr.mxu0 %v68_v3  ;;  %367 = vmatpush3.msra.mxu1 %v225_v6  ;;  %v217_v14 = vld [vmem:[#allocation7 + $0x38] sm:$0xff]  ;;  %v216_v15 = vld [vmem:[#allocation7 + $0x30] sm:$0xff]  ;;  %v215_v16 = vld [vmem:[#allocation7 + $0x28] sm:$0xff] }
  0x2b   :  { %360 = vmatpush3.msra.mxu0 %v68_v3  ;;  %368 = vmatprep.subr.mxu1 %v224_v7  ;;  %v214_v17 = vld [vmem:[#allocation7 + $0x20] sm:$0xff]  ;;  %v213_v18 = vld [vmem:[#allocation7 + $0x18] sm:$0xff]  ;;  %v212_v19 = vld [vmem:[#allocation7 + $0x10] sm:$0xff] }
  0x2c   :  { %361 = vmatprep.subr.mxu0 %v67_v4  ;;  %369 = vmatpush3.msra.mxu1 %v224_v7  ;;  %v211_v20 = vld [vmem:[#allocation7 + $0x8] sm:$0xff]  ;;  %v210_v21 = vld [vmem:[#allocation7] sm:$0xff]  ;;  %v187_v56 = vld [vmem:[%s573_s2] sm:$0x1] }
  0x2d   :  { %362 = vmatpush3.msra.mxu0 %v67_v4  ;;  %370 = vmatprep.subr.mxu1 %v223_v8  ;;  %v189_v60 = vld [vmem:[%s574_s3] sm:$0x1]  ;;  %s469_s3 = scalar_lea.vmem %s316_s17, 256 }
  0x2e   :  { %364 = vmatmul.mubr.msk.f32.vlgmr.msra.gmra.mxu0 %vm71_vm0, %v66_v5  ;;  %371 = vmatpush3.msra.mxu1 %v223_v8  ;;  %v330_v7 = vld [vmem:[%s576_s5] ss:$0 sm:$0xff]  ;;  %p470_p1 = scmp.ne.s32.totalorder %s316_s17, %s469_s3  ;;  %p475_p3 = scmp.lt.s32.totalorder %s469_s3, %s469_s3 }
  0x2f   :  { %372 = vmatprep.subr.mxu1 %v222_v9 }
  0x30   :  { %373 = vmatpush3.msra.mxu1 %v222_v9  ;;  %p476_p4 = por %p475_p3, %p474_p2 }
  0x31   :  { %374 = vmatprep.subr.mxu1 %v221_v10 }
  0x32   :  { %375 = vmatpush3.msra.mxu1 %v221_v10  ;;  %p477_p5 = pnand %p476_p4, %p470_p1 }
  0x33   :  { %376 = vmatprep.subr.mxu1 %v220_v11 }
  0x34   :  { %377 = vmatpush3.msra.mxu1 %v220_v11 }
  0x35   :  { %378 = vmatprep.subr.mxu1 %v219_v12 }
  0x36   :  { %379 = vmatpush3.msra.mxu1 %v219_v12 }
  0x37   :  { %380 = vmatprep.subr.mxu1 %v218_v13 }
  0x38   :  { %381 = vmatpush3.msra.mxu1 %v218_v13 }
  0x39   :  { %382 = vmatprep.subr.mxu1 %v217_v14 }
  0x3a   :  { %383 = vmatpush3.msra.mxu1 %v217_v14 }
  0x3b   :  { %384 = vmatprep.subr.mxu1 %v216_v15 }
  0x3c   :  { %385 = vmatpush3.msra.mxu1 %v216_v15 }
  0x3d   :  { %386 = vmatprep.subr.mxu1 %v215_v16 }
  0x3e   :  { %387 = vmatpush3.msra.mxu1 %v215_v16 }
  0x3f   :  { %388 = vmatprep.subr.mxu1 %v214_v17 }
  0x40   :  { %389 = vmatpush3.msra.mxu1 %v214_v17 }
  0x41   :  { %390 = vmatprep.subr.mxu1 %v213_v18 }
  0x42   :  { %391 = vmatpush3.msra.mxu1 %v213_v18 }
  0x43   :  { %392 = vmatprep.subr.mxu1 %v212_v19 }
  0x44   :  { %393 = vmatpush3.msra.mxu1 %v212_v19 }
  0x45   :  { %394 = vmatprep.subr.mxu1 %v211_v20 }
  0x46   :  { %395 = vmatpush3.msra.mxu1 %v211_v20 }
  0x47   :  { %396 = vmatprep.subr.mxu1 %v210_v21 }
  0x48   :  { %397 = vmatpush3.msra.mxu1 %v210_v21 }
  0xee   :  { %v365_v25 = vpop.f32.mrf.mxu0 }
  0xf0   :  { %v144_v26 = vpop.f32.mrf.mxu0 }
  0xf1   :  { %v156_v27 = vrot.slane %v144_v26, %v155_v24  ;;  %v166_v41 = vmul.f32 8.0, %v144_v26 }
  0xf3   :  { %v157_v28 = vsub.f32 %v144_v26, %v156_v27  ;;  %v158_v29 = vsub.f32 %v365_v25, %v156_v27  ;;  %v177_v46 = vmul.f32 %v166_v41, %v144_v26 }
  0xf5   :  { %v159_v30 = vadd.f32 %v158_v29, %v157_v28  ;;  %v168_v31 = vmul.f32 %v157_v28, %v157_v28  ;;  %v169_v32 = vmul.f32 %v158_v29, %v158_v29 }
  0xf7   :  { %v160_v33 = vrot.slane %v159_v30, 4  ;;  %v170_v34 = vadd.f32 %v169_v32, %v168_v31 }
  0xf9   :  { %v161_v35 = vadd.f32 %v160_v33, %v159_v30  ;;  %v171_v36 = vrot.slane %v170_v34, 4 }
  0xfb   :  { %v162_v37 = vrot.slane %v161_v35, 2  ;;  %v172_v38 = vadd.f32 %v171_v36, %v170_v34 }
  0xfd   :  { %v163_v39 = vadd.f32 %v162_v37, %v161_v35  ;;  %v173_v40 = vrot.slane %v172_v38, 2 }
  0xff   :  { %v164_v42 = vrot.slane %v163_v39, 1  ;;  %v174_v43 = vadd.f32 %v173_v40, %v172_v38 }
 0x101   :  { %v165_v44 = vadd.f32 %v164_v42, %v163_v39  ;;  %v175_v45 = vrot.slane %v174_v43, 1 }
 0x103   :  { %v167_v47 = vadd.f32 %v166_v41, %v165_v44  ;;  %v176_v48 = vadd.f32 %v175_v45, %v174_v43 }
 0x105   :  { %v178_v49 = vsub.f32 %v176_v48, %v177_v46  ;;  %v179_v50 = vmul.f32 0.125, %v167_v47 }
 0x107   :  { %v180_v51 = vmul.f32 0.125, %v178_v49  ;;  %v181_v52 = vmul.f32 %v179_v50, %v179_v50  ;;  %v184_v58 = vadd.f32 %v179_v50, %v144_v26 }
 0x109   :  { %v182_v53 = vsub.f32 %v180_v51, %v181_v52 }
 0x10b   :  { %v183_v54 = vmax.f32 %v182_v53, 0.0 }
 0x10d   :  { %v185_v55 = vadd.f32 1e-05, %v183_v54 }
 0x10f   :  { %407 = vrsqrt.f32 %v185_v55 }
 0x11c   :  { %v408_v57 = vpop.eup %407 }
 0x11d   :  { %v188_v59 = vmul.f32 %v408_v57, %v187_v56 }
 0x11f   :  { %v190_v61 = vmul.f32 %v188_v59, %v184_v58  ;;  %v196_v62 = vrot.slane %v188_v59, %v155_v24 }
 0x121   :  { %v191_v63 = vsub.f32 %v189_v60, %v190_v61  ;;  %v198_v0 = vmul.f32 %v196_v62, %v144_v26  ;;  %v199_v2 = vmul.f32 %v365_v25, %v196_v62 }
 0x123   :  { %v204_v1 = vrot.slane %v191_v63, %v155_v24 }
 0x125   :  { %v206_v3 = vadd.f32 %v204_v1, %v198_v0  ;;  %v207_v4 = vadd.f32 %v204_v1, %v199_v2 }
 0x127   :  { %v208_v5 = vmax.f32 %v206_v3, 0.0  ;;  %v209_v6 = vmax.f32 %v207_v4, 0.0 }
 0x129   :  { %398 = vmatprep.mubr.f32.mxu1 %v208_v5 }
 0x12a   :  { %399 = vmatmul.mubr.f32.vlgmr.msra.gmra.mxu1 %v209_v6 }
 0x1ea   :  { %v400_v8 = vpop.f32.mrf.mxu1 }
 0x1eb   :  { %v305_v9 = vadd.f32 %v400_v8, %v330_v7 }
 0x1ec   :  { %v299_v10 = vpop.f32.mrf.mxu1 }
 0x1ed   :  { %309 = vst [vmem:[#allocation8 + $0x8] sm:$0xff] %v305_v9  ;;  %v300_v11 = vadd.f32 %v330_v7, %v299_v10 }
 0x1ef   :  { %308 = vst [vmem:[#allocation8] sm:$0xff] %v300_v11 }
 0x1f0   :  { %480 = shalt.err (!%p477_p5)
}
 0x1f1   :  { %321 = dma.vmem_to_hbm [thread:$0]  %s316_s17, 256, %s577_s6, [#allocation4], %s497_s26, %s497_s26, %s498_s27  }
 0x1f2   :  { %493 = dma.done.wait [#allocation4], 256  }
 0x1f3   :  { %494 = vsyncadd [#allocation4], 4294967040 }
 0x1f4   :  { %325 = vsyncpa [#allocation3], 1 }
 0x1f5   :  { %326 = vsyncpa [#allocation6], 1 }
 0x1f6   :  { %327 = vsyncpa [#allocation4], 1 }

</bundles_post_ra>
